<compile_context>
chip_gen: v7x
topology: tpu7x:2x2x1
jax: 0.10.0
libtpu: 0.0.40
codegen_flags: <defaults>
</compile_context>

<pallas_src>
import math

import jax
import jax.numpy as jnp
from jax.experimental import pallas as pl
from jax.experimental.pallas import tpu as pltpu

# Logical layer sizes (PyTorch ModelC) and lane/MXU-friendly padded sizes.
H0_LOGICAL, H1_LOGICAL, C_LOGICAL = 100, 50, 10
H0_PAD, H1_PAD, C_PAD = 128, 64, 128   # matmul (MXU) padding
C_OUT_PAD = 16                          # narrow pad actually stored to HBM

VMEM_HEADROOM_BYTES = 2 * 1024 * 1024


def _round_up(n, m):
    return ((n + m - 1) // m) * m


def _vmem_budget_bytes():
    """96 MiB on 128-MiB-VMEM parts (v5e/v6e), conservative 32 MiB otherwise (v7x-safe)."""
    try:
        kind = jax.devices()[0].device_kind.lower()
    except Exception:
        return 32 << 20
    if "v5" in kind or "v6" in kind:
        return 96 << 20
    return 32 << 20


def _derive_batch_tile(batch, input_size, x_itemsize, vmem_budget, tb_cap):
    """Largest 8-aligned batch tile that fits the VMEM budget, while keeping
    the grid long enough (>= 8 steps) to pipeline across two TensorCores."""
    w_itemsize = 2  # bf16 weights
    param_bytes = 2 * (  # conservative: assume double-buffered even though resident
        (input_size * H0_PAD + H0_PAD * H1_PAD + H1_PAD * C_PAD) * w_itemsize
        + (H0_PAD + H1_PAD + C_PAD) * 4)
    bytes_per_row = (
        2 * input_size * x_itemsize            # x tile, double-buffered
        + 2 * C_OUT_PAD * 4                    # out tile, double-buffered
        + (H0_PAD + H1_PAD + C_PAD) * 4        # f32 intermediates
        + (H0_PAD + H1_PAD) * 2)               # bf16 casts feeding the MXU
    tb_max = (vmem_budget - VMEM_HEADROOM_BYTES - param_bytes) // bytes_per_row
    tb_max = max(8, (tb_max // 8) * 8)
    # Target >= 8 grid steps (2 TCs x >= 4 pipelined steps each) when possible.
    tb_target = _round_up(max(1, (batch + 7) // 8), 8)
    return max(8, min(tb_cap, tb_max, tb_target))


def _mlp_kernel(x_ref, w0_ref, b0_ref, w1_ref, b1_ref, w2_ref, b2_ref, o_ref):
    # Cast the streamed activations on the VPU (hidden under the DMA); weights
    # are already bf16 so all three matmuls hit the bf16 MXU path with f32 acc.
    x = x_ref[...].astype(w0_ref.dtype)

    # fc0 + bias + ReLU
    h0 = jnp.dot(x, w0_ref[...], preferred_element_type=jnp.float32) + b0_ref[...]
    h0 = jnp.maximum(h0, 0.0)
    # dropout (eval mode) -> identity

    # fc1 + bias + ReLU
    h1 = jnp.dot(h0.astype(w1_ref.dtype), w1_ref[...],
                 preferred_element_type=jnp.float32) + b1_ref[...]
    h1 = jnp.maximum(h1, 0.0)
    # dropout (eval mode) -> identity

    # fc2 (128-padded columns for the MXU)
    logits = jnp.dot(h1.astype(w2_ref.dtype), w2_ref[...],
                     preferred_element_type=jnp.float32) + b2_ref[...]

    # Keep only a narrow 16-wide class pad; mask the 6 padded lanes so they
    # vanish from the log_softmax (exp underflows to 0; no extra select needed).
    logits = logits[:, :C_OUT_PAD]
    lane = jax.lax.broadcasted_iota(jnp.int32, logits.shape, 1)
    lm = jnp.where(lane < C_LOGICAL, logits, jnp.float32(-1e30))
    m = jnp.max(lm, axis=1, keepdims=True)
    s = lm - m
    lse = jnp.log(jnp.sum(jnp.exp(s), axis=1, keepdims=True))
    o_ref[...] = (s - lse).astype(o_ref.dtype)


def model_c_forward(x, params, *, tb=4096):
    """x: any array whose elements flatten to (-1, input_size).

    Returns log_softmax logits of shape (batch, 10), float32 (eval-mode dropout).
    """
    w0, b0, w1, b1, w2, b2 = params  # padded shapes (see init_params)
    input_size = w0.shape[0]

    total = math.prod(x.shape)
    if total % input_size != 0:
        raise ValueError(
            f"input with {total} elements cannot be viewed as (-1, {input_size})")

    x2d = x.reshape(-1, input_size)         # no dtype cast, no batch padding
    batch = x2d.shape[0]
    x_itemsize = jnp.dtype(x2d.dtype).itemsize

    vmem_budget = _vmem_budget_bytes()
    tb_eff = _derive_batch_tile(batch, input_size, x_itemsize, vmem_budget, tb)
    grid = (pl.cdiv(batch, tb_eff),)        # partial last block masked by Pallas

    param_bytes = ((input_size * H0_PAD + H0_PAD * H1_PAD + H1_PAD * C_PAD)
                   * jnp.dtype(w0.dtype).itemsize
                   + (H0_PAD + H1_PAD + C_PAD) * 4)
    flops = 2 * batch * (input_size * H0_PAD + H0_PAD * H1_PAD + H1_PAD * C_PAD)
    transcendentals = batch * (C_OUT_PAD + 1)
    bytes_accessed = (batch * input_size * x_itemsize
                      + param_bytes
                      + batch * C_OUT_PAD * 4)

    out = pl.pallas_call(
        _mlp_kernel,
        out_shape=jax.ShapeDtypeStruct((batch, C_OUT_PAD), jnp.float32),
        grid=grid,
        in_specs=[
            pl.BlockSpec((tb_eff, input_size), lambda i: (i, 0)),   # x: streamed tiles
            pl.BlockSpec(w0.shape, lambda i: (0, 0)),               # weights/biases:
            pl.BlockSpec(b0.shape, lambda i: (0, 0)),               #   VMEM-resident
            pl.BlockSpec(w1.shape, lambda i: (0, 0)),
            pl.BlockSpec(b1.shape, lambda i: (0, 0)),
            pl.BlockSpec(w2.shape, lambda i: (0, 0)),
            pl.BlockSpec(b2.shape, lambda i: (0, 0)),
        ],
        out_specs=pl.BlockSpec((tb_eff, C_OUT_PAD), lambda i: (i, 0)),
        compiler_params=pltpu.CompilerParams(
            dimension_semantics=("parallel",),
            vmem_limit_bytes=vmem_budget,
        ),
        cost_estimate=pl.CostEstimate(
            flops=flops,
            transcendentals=transcendentals,
            bytes_accessed=bytes_accessed,
        ),
    )(x2d, w0, b0, w1, b1, w2, b2)

    # Drop the 6 padded class columns (cheap: 16-wide array).
    return out[:, :C_LOGICAL]


def init_params(key, input_size, *, param_dtype=jnp.bfloat16):
    """nn.Linear-style init (uniform +-1/sqrt(fan_in)).

    Weights are stored transposed (in_features, out_features), zero-padded to
    lane/MXU-friendly widths (100->128, 50->64, 10->128) and cast to bf16 once
    at init. Biases stay f32. Zero padding keeps the math identical to the
    unpadded network.
    """
    def linear(k, fan_in, fan_out, fan_in_pad, fan_out_pad):
        kw, kb = jax.random.split(k)
        bound = 1.0 / math.sqrt(fan_in)
        w = jax.random.uniform(kw, (fan_in, fan_out), jnp.float32, -bound, bound)
        b = jax.random.uniform(kb, (1, fan_out), jnp.float32, -bound, bound)
        w = jnp.pad(w, ((0, fan_in_pad - fan_in), (0, fan_out_pad - fan_out)))
        b = jnp.pad(b, ((0, 0), (0, fan_out_pad - fan_out)))
        return w.astype(param_dtype), b

    k0, k1, k2 = jax.random.split(key, 3)
    w0, b0 = linear(k0, input_size, H0_LOGICAL, input_size, H0_PAD)
    w1, b1 = linear(k1, H0_LOGICAL, H1_LOGICAL, H0_PAD, H1_PAD)
    w2, b2 = linear(k2, H1_LOGICAL, C_LOGICAL, H1_PAD, C_PAD)
    return (w0, b0, w1, b1, w2, b2)


def _reference(x2d, params):
    """Pure-JAX f32 reference (padded params; padding is zero so math matches)."""
    w0, b0, w1, b1, w2, b2 = params
    h0 = jnp.maximum(x2d @ w0.astype(jnp.float32) + b0, 0.0)
    h1 = jnp.maximum(h0 @ w1.astype(jnp.float32) + b1, 0.0)
    logits = (h1 @ w2.astype(jnp.float32) + b2)[:, :C_LOGICAL]
    return jax.nn.log_softmax(logits, axis=1)


if __name__ == "__main__":
    key = jax.random.PRNGKey(0)
    k_x, k_p = jax.random.split(key)

    input_size = 64           # image_size
    batch = 2
    # e.g. a (2, 4, 4, 4) "image" tensor that the forward flattens to (-1, 64)
    x = jax.random.normal(k_x, (batch, 4, 4, 4), jnp.float32)

    params = init_params(k_p, input_size)

    out = model_c_forward(x, params)
    out = jax.block_until_ready(out)

    assert out.shape == (batch, C_LOGICAL)
    # log_softmax rows should sum to 1 after exp
    row_sums = jnp.exp(out.astype(jnp.float32)).sum(axis=1)
    assert bool(jnp.all(jnp.abs(row_sums - 1.0) < 1e-4))
    assert bool(jnp.all(jnp.isfinite(out)))

    # numerical check vs pure-JAX f32 reference (bf16 MXU tolerance)
    ref = _reference(x.reshape(-1, input_size).astype(jnp.float32), params)
    assert bool(jnp.max(jnp.abs(out - ref)) < 0.1)

    print("KERNEL_OK")
</pallas_src>

<mosaic_0001>
module attributes {stable_mosaic.version = 11 : i64} {
  func.func @_mlp_kernel(%arg0: i32, %arg1: memref<8x64xf32, #tpu.memory_space<vmem>>, %arg2: memref<64x128xbf16, #tpu.memory_space<vmem>>, %arg3: memref<1x128xf32, #tpu.memory_space<vmem>>, %arg4: memref<128x64xbf16, #tpu.memory_space<vmem>>, %arg5: memref<1x64xf32, #tpu.memory_space<vmem>>, %arg6: memref<64x128xbf16, #tpu.memory_space<vmem>>, %arg7: memref<1x128xf32, #tpu.memory_space<vmem>>, %arg8: memref<8x16xf32, #tpu.memory_space<vmem>>) attributes {dimension_semantics = [#tpu.dimension_semantics<parallel>], iteration_bounds = array<i64: 1>, scalar_prefetch = 0 : i64, scratch_operands = 0 : i64, tpu.core_type = #tpu.core_type<tc>, window_params = [{transform_indices = @transform_0, window_bounds = array<i64: 8, 64>}, {pipeline_mode = #tpu.pipeline_mode<synchronous>, transform_indices = @transform_1, window_bounds = array<i64: 64, 128>}, {pipeline_mode = #tpu.pipeline_mode<synchronous>, transform_indices = @transform_2, window_bounds = array<i64: 1, 128>}, {pipeline_mode = #tpu.pipeline_mode<synchronous>, transform_indices = @transform_3, window_bounds = array<i64: 128, 64>}, {pipeline_mode = #tpu.pipeline_mode<synchronous>, transform_indices = @transform_4, window_bounds = array<i64: 1, 64>}, {pipeline_mode = #tpu.pipeline_mode<synchronous>, transform_indices = @transform_5, window_bounds = array<i64: 64, 128>}, {pipeline_mode = #tpu.pipeline_mode<synchronous>, transform_indices = @transform_6, window_bounds = array<i64: 1, 128>}, {transform_indices = @transform_7, window_bounds = array<i64: 8, 16>}]} {
    %c0 = arith.constant 0 : index
    %c0_0 = arith.constant 0 : index
    %0 = vector.load %arg1[%c0, %c0_0] : memref<8x64xf32, #tpu.memory_space<vmem>>, vector<8x64xf32>
    %1 = arith.truncf %0 : vector<8x64xf32> to vector<8x64xbf16>
    %c0_1 = arith.constant 0 : index
    %c0_2 = arith.constant 0 : index
    %2 = vector.load %arg2[%c0_1, %c0_2] : memref<64x128xbf16, #tpu.memory_space<vmem>>, vector<64x128xbf16>
    %cst = arith.constant dense<0.000000e+00> : vector<8x128xf32>
    %3 = tpu.matmul %1, %2, %cst {dimension_numbers = #tpu.dot_dimension_numbers<[1], [0], [0], [1], [0, 0, 1, 1], [], []>} : vector<8x64xbf16>, vector<64x128xbf16>, vector<8x128xf32> -> vector<8x128xf32>
    %c0_3 = arith.constant 0 : index
    %c0_4 = arith.constant 0 : index
    %4 = vector.load %arg3[%c0_3, %c0_4] : memref<1x128xf32, #tpu.memory_space<vmem>>, vector<1x128xf32>
    %5 = vector.broadcast %4 : vector<1x128xf32> to vector<8x128xf32>
    %6 = arith.addf %3, %5 : vector<8x128xf32>
    %cst_5 = arith.constant 0.000000e+00 : f32
    %7 = vector.broadcast %cst_5 : f32 to vector<8x128xf32>
    %8 = arith.maximumf %6, %7 : vector<8x128xf32>
    %9 = arith.truncf %8 : vector<8x128xf32> to vector<8x128xbf16>
    %c0_6 = arith.constant 0 : index
    %c0_7 = arith.constant 0 : index
    %10 = vector.load %arg4[%c0_6, %c0_7] : memref<128x64xbf16, #tpu.memory_space<vmem>>, vector<128x64xbf16>
    %cst_8 = arith.constant dense<0.000000e+00> : vector<8x64xf32>
    %11 = tpu.matmul %9, %10, %cst_8 {dimension_numbers = #tpu.dot_dimension_numbers<[1], [0], [0], [1], [0, 0, 1, 1], [], []>} : vector<8x128xbf16>, vector<128x64xbf16>, vector<8x64xf32> -> vector<8x64xf32>
    %c0_9 = arith.constant 0 : index
    %c0_10 = arith.constant 0 : index
    %12 = vector.load %arg5[%c0_9, %c0_10] : memref<1x64xf32, #tpu.memory_space<vmem>>, vector<1x64xf32>
    %13 = vector.broadcast %12 : vector<1x64xf32> to vector<8x64xf32>
    %14 = arith.addf %11, %13 : vector<8x64xf32>
    %cst_11 = arith.constant 0.000000e+00 : f32
    %15 = vector.broadcast %cst_11 : f32 to vector<8x64xf32>
    %16 = arith.maximumf %14, %15 : vector<8x64xf32>
    %17 = arith.truncf %16 : vector<8x64xf32> to vector<8x64xbf16>
    %c0_12 = arith.constant 0 : index
    %c0_13 = arith.constant 0 : index
    %18 = vector.load %arg6[%c0_12, %c0_13] : memref<64x128xbf16, #tpu.memory_space<vmem>>, vector<64x128xbf16>
    %cst_14 = arith.constant dense<0.000000e+00> : vector<8x128xf32>
    %19 = tpu.matmul %17, %18, %cst_14 {dimension_numbers = #tpu.dot_dimension_numbers<[1], [0], [0], [1], [0, 0, 1, 1], [], []>} : vector<8x64xbf16>, vector<64x128xbf16>, vector<8x128xf32> -> vector<8x128xf32>
    %c0_15 = arith.constant 0 : index
    %c0_16 = arith.constant 0 : index
    %20 = vector.load %arg7[%c0_15, %c0_16] : memref<1x128xf32, #tpu.memory_space<vmem>>, vector<1x128xf32>
    %21 = vector.broadcast %20 : vector<1x128xf32> to vector<8x128xf32>
    %22 = arith.addf %19, %21 : vector<8x128xf32>
    %23 = vector.extract_strided_slice %22 {offsets = [0, 0], sizes = [8, 16], strides = [1, 1]} : vector<8x128xf32> to vector<8x16xf32>
    %24 = tpu.iota {dimensions = array<i32: 1>} : vector<8x16xi32>
    %c10_i32 = arith.constant 10 : i32
    %25 = vector.broadcast %c10_i32 : i32 to vector<8x16xi32>
    %26 = arith.cmpi slt, %24, %25 : vector<8x16xi32>
    %cst_17 = arith.constant -1.000000e+30 : f32
    %27 = vector.broadcast %cst_17 : f32 to vector<8x16xf32>
    %28 = arith.select %26, %23, %27 : vector<8x16xi1>, vector<8x16xf32>
    %cst_18 = arith.constant dense<0xFF800000> : vector<8xf32>
    %29 = vector.multi_reduction <maximumf>, %28, %cst_18 [1] : vector<8x16xf32> to vector<8xf32>
    %30 = vector.shape_cast %29 : vector<8xf32> to vector<8x1xf32>
    %31 = vector.broadcast %30 : vector<8x1xf32> to vector<8x16xf32>
    %32 = arith.subf %28, %31 : vector<8x16xf32>
    %33 = math.exp %32 : vector<8x16xf32>
    %cst_19 = arith.constant dense<0.000000e+00> : vector<8xf32>
    %34 = vector.multi_reduction <add>, %33, %cst_19 [1] : vector<8x16xf32> to vector<8xf32>
    %35 = vector.shape_cast %34 : vector<8xf32> to vector<8x1xf32>
    %36 = math.log %35 : vector<8x1xf32>
    %37 = vector.broadcast %36 : vector<8x1xf32> to vector<8x16xf32>
    %38 = arith.subf %32, %37 : vector<8x16xf32>
    %c0_20 = arith.constant 0 : index
    %c0_21 = arith.constant 0 : index
    %39 = vector.load %arg8[%c0_20, %c0_21] : memref<8x16xf32, #tpu.memory_space<vmem>>, vector<8x16xf32>
    tpu.vector_store %arg8[%c0_20, %c0_21], %38 {strides = array<i32>} : memref<8x16xf32, #tpu.memory_space<vmem>>, vector<8x16xf32>,
    return
  }
  func.func @transform_0(%arg0: i32) -> (i32, i32) {
    %c0_i32 = arith.constant 0 : i32
    %c0_i32_0 = arith.constant 0 : i32
    return %arg0, %c0_i32 : i32, i32
  }
  func.func @transform_1(%arg0: i32) -> (i32, i32) {
    %c0_i32 = arith.constant 0 : i32
    %c0_i32_0 = arith.constant 0 : i32
    %c0_i32_1 = arith.constant 0 : i32
    return %c0_i32, %c0_i32_0 : i32, i32
  }
  func.func @transform_2(%arg0: i32) -> (i32, i32) {
    %c0_i32 = arith.constant 0 : i32
    %c0_i32_0 = arith.constant 0 : i32
    %c0_i32_1 = arith.constant 0 : i32
    return %c0_i32, %c0_i32_0 : i32, i32
  }
  func.func @transform_3(%arg0: i32) -> (i32, i32) {
    %c0_i32 = arith.constant 0 : i32
    %c0_i32_0 = arith.constant 0 : i32
    %c0_i32_1 = arith.constant 0 : i32
    return %c0_i32, %c0_i32_0 : i32, i32
  }
  func.func @transform_4(%arg0: i32) -> (i32, i32) {
    %c0_i32 = arith.constant 0 : i32
    %c0_i32_0 = arith.constant 0 : i32
    %c0_i32_1 = arith.constant 0 : i32
    return %c0_i32, %c0_i32_0 : i32, i32
  }
  func.func @transform_5(%arg0: i32) -> (i32, i32) {
    %c0_i32 = arith.constant 0 : i32
    %c0_i32_0 = arith.constant 0 : i32
    %c0_i32_1 = arith.constant 0 : i32
    return %c0_i32, %c0_i32_0 : i32, i32
  }
  func.func @transform_6(%arg0: i32) -> (i32, i32) {
    %c0_i32 = arith.constant 0 : i32
    %c0_i32_0 = arith.constant 0 : i32
    %c0_i32_1 = arith.constant 0 : i32
    return %c0_i32, %c0_i32_0 : i32, i32
  }
  func.func @transform_7(%arg0: i32) -> (i32, i32) {
    %c0_i32 = arith.constant 0 : i32
    %c0_i32_0 = arith.constant 0 : i32
    return %arg0, %c0_i32 : i32, i32
  }
}

</mosaic_0001>

<bundles_post_ra>
// kernel: tpu_custom_call.1
= control target key start
LH: loop header
LB: loop body
LE: loop exit
PB: predicated region body
PF: predicated region fallthrough
CT: control target
= control target key end

     0   :  { %12 = vsyncpa [#allocation3], 0  ;;  %v477_v1 = vmov 0.0   ;;  %vm478_vm0 = vmmov 0   ;;  %vm69_vm1 = vcmask 523264   ;;  %v310_v35 = vlaneseq  ;;  %s602_s0 = inlined_call_operand.vmem [shape: f32[2,64], index: 0, kind: input, shape index: {}]   ;;  %s603_s1 = inlined_call_operand.vmem [shape: bf16[64,128], index: 1, kind: input, shape index: {}]   ;;  %s604_s2 = inlined_call_operand.vmem [shape: f32[1,128], index: 2, kind: input, shape index: {}]   ;;  %s605_s3 = inlined_call_operand.vmem [shape: bf16[128,64], index: 3, kind: input, shape index: {}]   ;;  %s606_s4 = inlined_call_operand.vmem [shape: f32[1,64], index: 4, kind: input, shape index: {}]   ;;  %s607_s5 = inlined_call_operand.vmem [shape: bf16[64,128], index: 5, kind: input, shape index: {}]   ;;  %s608_s6 = inlined_call_operand.vmem [shape: f32[1,128], index: 6, kind: input, shape index: {}]   ;;  %s609_s7 = inlined_call_operand.hbm [shape: f32[2,16], index: 7, kind: output, shape index: {}]  }
   0x1   :  { %v433_v0 = vld [vmem:[%s603_s1] sm:$0xff]   ;;  %384 = vmatprep.subr.bf16.mxu0 %v477_v1  ;;  %396 = vmatprep.subr.bf16.mxu1 %v477_v1  ;;  %v434_v2 = vld [vmem:[%s603_s1 + $0x8] sm:$0xff]   ;;  %v435_v4 = vld [vmem:[%s603_s1 + $0x10] sm:$0xff]   ;;  %vm314_vm3 = vcmask 130048  }
   0x2   :  { %385 = vmatpush3.bf16.msra.mxu0 %v433_v0  ;;  %392 = vmatprep.mubr.msk.bf16.mxu0 %vm478_vm0, %v477_v1  ;;  %v437_v3 = vld [vmem:[%s605_s3] sm:$0xff]   ;;  %v438_v5 = vld [vmem:[%s605_s3 + $0x8] sm:$0xff]   ;;  %v436_v6 = vld [vmem:[%s603_s1 + $0x18] sm:$0xff]   ;;  %v311_v36 = vand.u32 127, %v310_v35 }
   0x3   :  { %386 = vmatprep.subr.bf16.mxu0 %v477_v1  ;;  %412 = vmatprep.mubr.msk.bf16.mxu1 %vm478_vm0, %v477_v1  ;;  %v28_v7 = vld [vmem:[%s602_s0] sm:$0xff]  ;;  %v439_v8 = vld [vmem:[%s605_s3 + $0x10] sm:$0xff]   ;;  %v440_v10 = vld [vmem:[%s605_s3 + $0x18] sm:$0xff]  }
   0x4   :  { %397 = vmatpush3.bf16.msra.mxu1 %v437_v3  ;;  %v29_v9 = vpack.c.bf16 %v28_v7, %v28_v7  ;;  %v441_v11 = vld [vmem:[%s605_s3 + $0x20] sm:$0xff]   ;;  %v442_v12 = vld [vmem:[%s605_s3 + $0x28] sm:$0xff]   ;;  %v443_v13 = vld [vmem:[%s605_s3 + $0x30] sm:$0xff]   ;;  %vm312_vm2 = vcmp.lt.s32.totalorder %v311_v36, 10 }
   0x5   :  { %398 = vmatprep.subr.bf16.mxu1 %v477_v1  ;;  %v444_v14 = vld [vmem:[%s605_s3 + $0x38] sm:$0xff]   ;;  %v445_v15 = vld [vmem:[%s607_s5] sm:$0xff]   ;;  %v446_v16 = vld [vmem:[%s607_s5 + $0x8] sm:$0xff]  }
   0x6   :  { %387 = vmatpush3.bf16.msra.mxu0 %v434_v2  ;;  %v344_v17 = vld [vmem:[%s604_s2] ss:$0 sm:$0xff]  ;;  %v447_v25 = vld [vmem:[%s607_s5 + $0x10] sm:$0xff]   ;;  %v448_v26 = vld [vmem:[%s607_s5 + $0x18] sm:$0xff]  }
   0x7   :  { %388 = vmatprep.subr.bf16.mxu0 %v477_v1  ;;  %v350_v27 = vld [vmem:[%s606_s4] ss:$0 sm:$0xff] }
   0x8   :  { %399 = vmatpush3.bf16.msra.mxu1 %v438_v5  ;;  %v359_v37 = vld [vmem:[%s608_s6] ss:$0 sm:$0xff] }
   0x9   :  { %400 = vmatprep.subr.bf16.mxu1 %v477_v1 }
   0xa   :  { %389 = vmatpush3.bf16.msra.mxu0 %v435_v4 }
   0xb   :  { %390 = vmatprep.subr.bf16.mxu0 %v477_v1 }
   0xc   :  { %401 = vmatpush3.bf16.msra.mxu1 %v439_v8 }
   0xd   :  { %402 = vmatprep.subr.bf16.mxu1 %v477_v1 }
   0xe   :  { %391 = vmatpush3.bf16.msra.mxu0 %v436_v6 }
   0xf   :  { %416 = vmatprep.subr.bf16.mxu0 %v477_v1 }
  0x10   :  { %403 = vmatpush3.bf16.msra.mxu1 %v440_v10 }
  0x11   :  { %393 = vmatmul.mubr.msk.bf16.vlgmr.msra.gmra.mrb[0].mxu0 %vm69_vm1, %v29_v9  ;;  %404 = vmatprep.subr.bf16.mxu1 %v477_v1 }
  0x12   :  { %424 = vmatprep.mubr.msk.bf16.mxu0 %vm478_vm0, %v477_v1  ;;  %417 = vmatpush3.bf16.msra.mxu0 %v445_v15 }
  0x13   :  { %418 = vmatprep.subr.bf16.mxu0 %v477_v1 }
  0x14   :  { %405 = vmatpush3.bf16.msra.mxu1 %v441_v11 }
  0x15   :  { %406 = vmatprep.subr.bf16.mxu1 %v477_v1 }
  0x16   :  { %419 = vmatpush3.bf16.msra.mxu0 %v446_v16 }
  0x17   :  { %420 = vmatprep.subr.bf16.mxu0 %v477_v1 }
  0x18   :  { %407 = vmatpush3.bf16.msra.mxu1 %v442_v12 }
  0x19   :  { %408 = vmatprep.subr.bf16.mxu1 %v477_v1 }
  0x1a   :  { %421 = vmatpush3.bf16.msra.mxu0 %v447_v25 }
  0x1b   :  { %422 = vmatprep.subr.bf16.mxu0 %v477_v1 }
  0x1c   :  { %409 = vmatpush3.bf16.msra.mxu1 %v443_v13 }
  0x1d   :  { %410 = vmatprep.subr.bf16.mxu1 %v477_v1 }
  0x1e   :  { %423 = vmatpush3.bf16.msra.mxu0 %v448_v26 }
  0x20   :  { %411 = vmatpush3.bf16.msra.mxu1 %v444_v14 }
  0xe4   :  { %v107_v18 = vpop.f32.mrb[0].mxu0 }
  0xe5   :  { %v108_v19 = vadd.f32 %v344_v17, %v107_v18  ;;  %v394_v20 = vpop.f32.mrb[1].mxu0 }
  0xe6   :  { %v110_v21 = vpop.f32.mrb[2].mxu0 }
  0xe7   :  { %v113_v22 = vmax.f32 %v108_v19, 0.0  ;;  %v395_v23 = vpop.f32.mrb[3].mxu0 }
  0xe9   :  { %v114_v24 = vpack.c.bf16 %v113_v22, %v113_v22 }
  0xeb   :  { %413 = vmatmul.mubr.bf16.vlgmr.msra.gmra.mrb[0].mxu1 %v114_v24 }
 0x1be   :  { %v220_v28 = vpop.f32.mrb[0].mxu1 }
 0x1bf   :  { %v221_v29 = vadd.f32 %v350_v27, %v220_v28  ;;  %v414_v30 = vpop.f32.mrb[1].mxu1 }
 0x1c0   :  { %v223_v31 = vpop.f32.mrb[2].mxu1 }
 0x1c1   :  { %v226_v32 = vmax.f32 %v221_v29, 0.0  ;;  %v415_v33 = vpop.f32.mrb[3].mxu1 }
 0x1c3   :  { %v227_v34 = vpack.c.bf16 %v226_v32, %v226_v32 }
 0x1c5   :  { %425 = vmatmul.mubr.msk.bf16.vlgmr.msra.gmra.mrb[4].mxu0 %vm69_vm1, %v227_v34 }
 0x298   :  { %v304_v38 = vpop.f32.mrb[4].mxu0 }
 0x299   :  { %v305_v39 = vadd.f32 %v359_v37, %v304_v38  ;;  %v426_v40 = vpop.f32.mrb[5].mxu0 }
 0x29a   :  { %v307_v41 = vpop.f32.mrb[6].mxu0 }
 0x29b   :  { %v427_v42 = vpop.f32.mrb[7].mxu0  ;;  %v313_v43 = vsel %vm312_vm2, %v305_v39, -1e+30 }
 0x29c   :  { %v315_v44 = vsel %vm314_vm3, %v313_v43, -inf }
 0x29d   :  { %316 = vmax.xlane.f32.xlu0 %v315_v44 }
 0x32a   :  { %v317_v45 = vpop.xlane.xlu0 %316 }
 0x32b   :  { %v318_v46 = vsub.f32 %v313_v43, %v317_v45 }
 0x32d   :  { %v319_v47 = vmul.f32 1.442695, %v318_v46 }
 0x32f   :  { %449 = vpow2.f32 %v319_v47 }
 0x339   :  { %v450_v48 = vpop.eup %449 }
 0x33a   :  { %v321_v49 = vsel %vm314_vm3, %v450_v48, 0.0 }
 0x33b   :  { %322 = vadd.xlane.f32.xlu0 %v321_v49 }
 0x3c8   :  { %v323_v50 = vpop.xlane.xlu0 %322 }
 0x3c9   :  { %451 = vlog2.f32 %v323_v50 }
 0x3d3   :  { %v452_v51 = vpop.eup %451 }
 0x3d4   :  { %v325_v52 = vmul.f32 0.6931472, %v452_v51 }
 0x3d6   :  { %v326_v53 = vsub.f32 %v318_v46, %v325_v52 }
 0x3d8   :  { %327 = vst.msk [vmem:[#allocation2] sm:$0xff] %vm314_vm3, %v326_v53 }
 0x3d9   :  { %332 = vsyncadd [#allocation3], 96  ;;  %s479_s4 = smov [#allocation2]  }
 0x3da   :  { %s333_s5 = sshll.u32 %s479_s4, 4  ;;  %s334_s5 = int_to_ptr.vmem [resolvable:$true] %s333_s5 }
 0x3db   :  { %s453_s6 = scalar_lea.vmem %s334_s5, 32  ;;  %s457_s14 = scalar_lea.vmem %s334_s5, 128 }
 0x3dc   :  { %p454_p0 = scmp.ne.s32.totalorder %s334_s5, %s453_s6  ;;  %p458_p1 = scmp.lt.s32.totalorder %s334_s5, %s334_s5 }
 0x3dd   :  { %p459_p2 = scmp.lt.s32.totalorder %s457_s14, %s453_s6 }
 0x3df   :  { %p460_p3 = por %p459_p2, %p458_p1 }
 0x3e1   :  { %p461_p4 = pnand %p460_p3, %p454_p0 }
 0x3e3   :  { %464 = shalt.err (!%p461_p4)
}
 0x3e4   :  { %s465_s17 = scalar_lea.hbm %s609_s7, 32 }
 0x3e5   :  { %p466_p5 = scmp.ne.s32.totalorder %s609_s7, %s465_s17  ;;  %p469_p6 = scmp.lt.u32.totalorder %s465_s17, %s609_s7 }
 0x3e7   :  { %p471_p7 = pnand %p469_p6, %p466_p5 }
 0x3e9   :  { %474 = shalt.err (!%p471_p7)
}
 0x3ea   :  { %s480_s20 = smov 32   ;;  %s481_s21 = smov 2  }
 0x3eb   :  { %339 = dma.vmem_to_hbm [thread:$0]  %s334_s5, 32, %s609_s7, [#allocation3], %s480_s20, %s480_s20, %s481_s21  }
 0x3ec   :  { %475 = dma.done.wait [#allocation3], 128  }
 0x3ed   :  { %476 = vsyncadd [#allocation3], 4294967168 }
 0x3ee   :  { %343 = vsyncpa [#allocation3], 1 }

</bundles_post_ra>
